<compile_context>
chip_gen: v7x
topology: tpu7x:2x2x1
jax: 0.10.0
libtpu: 0.0.40
codegen_flags: <defaults>
</compile_context>

<pallas_src>
import functools

import numpy as np
import jax
import jax.numpy as jnp
from jax import lax
from jax.experimental import pallas as pl
from jax.experimental.pallas import tpu as pltpu


# ------------------------------- kernel ------------------------------------


def _silu_kernel(z):
    # SiLU(z) = z * sigmoid(z); exp + approx reciprocal both go to the EUP.
    return z * pl.reciprocal(1.0 + jnp.exp(-z), approx=True)


def _c3_kernel(n_bottleneck, shifts,
               x_ref, mask_ref,
               w1_ref, s1_ref, b1_ref,            # cv1 (1x1)
               w2_ref, s2_ref, b2_ref,            # cv2 (1x1)
               wb1_ref, sb1_ref, bb1_ref,         # bottleneck cv1 (1x1), stacked over n
               wb2_ref, sb2_ref, bb2_ref,         # bottleneck cv2 (3x3 -> 9 taps), stacked
               w3_ref, s3_ref, b3_ref,            # cv3 (1x1) on the channel concat
               o_ref):
    x = x_ref[0]                                   # (C1p, HW) bf16

    y1 = _silu_kernel(s1_ref[...] *
                      jnp.dot(w1_ref[...], x, preferred_element_type=jnp.float32)
                      + b1_ref[...])
    y2 = _silu_kernel(s2_ref[...] *
                      jnp.dot(w2_ref[...], x, preferred_element_type=jnp.float32)
                      + b2_ref[...])

    def bottleneck(i, m):
        mb = m.astype(jnp.bfloat16)
        t = _silu_kernel(sb1_ref[i] *
                         jnp.dot(wb1_ref[i], mb, preferred_element_type=jnp.float32)
                         + bb1_ref[i])
        tb = t.astype(jnp.bfloat16)
        acc = jnp.zeros_like(m)                    # f32 accumulator (c_p, HW)
        for tap, shift in enumerate(shifts):
            if shift == 0:                         # center tap: no shift, mask all-ones
                src = tb
            else:
                # lane-axis rotation + zero out columns whose source tap is
                # out of the (H, W) bounds of the un-flattened image.
                src = (pltpu.roll(t, shift=shift, axis=1) * mask_ref[tap]
                       ).astype(jnp.bfloat16)
            acc = acc + jnp.dot(wb2_ref[i * 9 + tap], src,
                                preferred_element_type=jnp.float32)
        t2 = _silu_kernel(sb2_ref[i] * acc + bb2_ref[i])
        return m + t2                              # shortcut add (c1 == c2, shortcut=True)

    m = lax.fori_loop(0, n_bottleneck, bottleneck, y1)

    # cv3 applied to channel-concat [m ; y2] as ONE deeper MXU contraction.
    cat = jnp.concatenate([m, y2], axis=0).astype(jnp.bfloat16)   # (2*c_p, HW)
    z = jnp.dot(w3_ref[...], cat, preferred_element_type=jnp.float32)
    o_ref[0] = _silu_kernel(s3_ref[...] * z + b3_ref[...]).astype(o_ref.dtype)


# ----------------------------- host wrapper ---------------------------------


def _make_tap_masks(H, W):
    """Per-tap boundary mask (1/0) and static lane-roll amount (jnp.roll convention)."""
    HW = H * W
    idx = np.arange(HW)
    ii, jj = idx // W, idx % W
    masks = np.zeros((9, 1, HW), np.float32)
    shifts = []
    tap = 0
    for dy in (-1, 0, 1):
        for dx in (-1, 0, 1):
            vi, vj = ii + dy, jj + dx
            valid = (vi >= 0) & (vi < H) & (vj >= 0) & (vj < W)
            masks[tap, 0, :] = valid.astype(np.float32)
            shifts.append(int((-(dy * W + dx)) % HW))
            tap += 1
    return jnp.asarray(masks), tuple(shifts)


def _round_up(v, m):
    return (v + m - 1) // m * m


def c3_pallas(x_nchw, params):
    x_nchw = x_nchw.astype(jnp.float32)
    N, C1, H, W = x_nchw.shape
    HW = H * W

    w1, s1, b1 = params["cv1"]
    w2, s2, b2 = params["cv2"]
    w3, s3, b3 = params["cv3"]
    c_ = w1.shape[0]
    C2 = w3.shape[0]
    n = len(params["m"])

    # Pad channel dims to multiples of 8 sublanes (exact: padded channels stay 0).
    C1p = _round_up(C1, 8)
    cp = _round_up(c_, 8)
    C2p = _round_up(C2, 8)

    def colp(v, rows):                              # (C,) -> padded (rows, 1) f32
        v = jnp.asarray(v, jnp.float32).reshape(-1, 1)
        return jnp.pad(v, ((0, rows - v.shape[0]), (0, 0)))

    def padw(w, rows, cols):                        # 2-D weight -> padded bf16
        w = jnp.asarray(w, jnp.float32)
        return jnp.pad(w, ((0, rows - w.shape[0]), (0, cols - w.shape[1]))
                       ).astype(jnp.bfloat16)

    # 1x1 conv weights (OIHW) -> (Cout, Cin), padded, bf16.
    w1_k = padw(w1[:, :, 0, 0], cp, C1p)
    w2_k = padw(w2[:, :, 0, 0], cp, C1p)

    # cv3 weight split on the concat axis, each half padded to cp columns.
    w3_full = jnp.asarray(w3[:, :, 0, 0], jnp.float32)
    w3a = jnp.pad(w3_full[:, :c_], ((0, C2p - C2), (0, cp - c_)))
    w3b = jnp.pad(w3_full[:, c_:], ((0, C2p - C2), (0, cp - c_)))
    w3_k = jnp.concatenate([w3a, w3b], axis=1).astype(jnp.bfloat16)   # (C2p, 2*cp)

    wb1_k = jnp.stack([padw(bp["cv1"][0][:, :, 0, 0], cp, cp) for bp in params["m"]])
    sb1_k = jnp.stack([colp(bp["cv1"][1], cp) for bp in params["m"]])
    bb1_k = jnp.stack([colp(bp["cv1"][2], cp) for bp in params["m"]])

    # 3x3 conv weights (OIHW) -> (n*9, cp, cp), tap = (dy+1)*3 + (dx+1).
    wb2_taps = []
    for bp in params["m"]:
        wt = jnp.transpose(jnp.asarray(bp["cv2"][0], jnp.float32), (2, 3, 0, 1))
        wt = wt.reshape(9, c_, c_)
        wb2_taps.append(jnp.pad(wt, ((0, 0), (0, cp - c_), (0, cp - c_))))
    wb2_k = jnp.concatenate(wb2_taps, axis=0).astype(jnp.bfloat16)    # (n*9, cp, cp)
    sb2_k = jnp.stack([colp(bp["cv2"][1], cp) for bp in params["m"]])
    bb2_k = jnp.stack([colp(bp["cv2"][2], cp) for bp in params["m"]])

    masks, shifts = _make_tap_masks(H, W)                             # (9, 1, HW) f32

    x_flat = jnp.pad(x_nchw.reshape(N, C1, HW),
                     ((0, 0), (0, C1p - C1), (0, 0))).astype(jnp.bfloat16)

    inputs = [x_flat, masks,
              w1_k, colp(s1, cp), colp(b1, cp),
              w2_k, colp(s2, cp), colp(b2, cp),
              wb1_k, sb1_k, bb1_k,
              wb2_k, sb2_k, bb2_k,
              w3_k, colp(s3, C2p), colp(b3, C2p)]

    def full_spec(a):
        nd = a.ndim
        return pl.BlockSpec(a.shape, lambda b, _nd=nd: (0,) * _nd)

    in_specs = ([pl.BlockSpec((1, C1p, HW), lambda b: (b, 0, 0))]
                + [full_spec(a) for a in inputs[1:]])
    out_spec = pl.BlockSpec((1, C2p, HW), lambda b: (b, 0, 0))

    out_flat = pl.pallas_call(
        functools.partial(_c3_kernel, n, shifts),
        out_shape=jax.ShapeDtypeStruct((N, C2p, HW), jnp.float32),
        grid_spec=pltpu.PrefetchScalarGridSpec(
            num_scalar_prefetch=0,
            grid=(N,),
            in_specs=in_specs,
            out_specs=out_spec),
        compiler_params=pltpu.CompilerParams(
            dimension_semantics=("parallel",),
            vmem_limit_bytes=48 * 1024 * 1024),
    )(*inputs)
    return out_flat[:, :C2, :].reshape(N, C2, H, W)


# ----------------------- deterministic parameter init -----------------------


def _init_conv_bn(key, cout, cin, k):
    """Conv2d(bias=False) weight + BatchNorm2d folded (inference) into (scale, bias)."""
    kw, kg, kb, km, kv = jax.random.split(key, 5)
    fan_in = cin * k * k
    w = jax.random.normal(kw, (cout, cin, k, k), jnp.float32) / np.sqrt(fan_in)
    gamma = jax.random.uniform(kg, (cout,), jnp.float32, 0.8, 1.2)
    beta = 0.1 * jax.random.normal(kb, (cout,), jnp.float32)
    mean = 0.1 * jax.random.normal(km, (cout,), jnp.float32)
    var = jax.random.uniform(kv, (cout,), jnp.float32, 0.5, 1.5)
    eps = 1e-5
    scale = gamma / jnp.sqrt(var + eps)
    bias = beta - mean * scale
    return w, scale, bias


def init_c3_params(key, c1, c2, n=1, e=0.5):
    # TODO(synk): BatchNorm2d batch-statistics update (training mode) is not modeled;
    # BN is applied in its inference-time affine (folded) form.
    c_ = int(c2 * e)
    keys = jax.random.split(key, 3 + 2 * n)
    params = {
        "cv1": _init_conv_bn(keys[0], c_, c1, 1),
        "cv2": _init_conv_bn(keys[1], c_, c1, 1),
        "cv3": _init_conv_bn(keys[2], c2, 2 * c_, 1),
        "m": [],
    }
    for i in range(n):
        params["m"].append({
            "cv1": _init_conv_bn(keys[3 + 2 * i], c_, c_, 1),   # Bottleneck e=1.0
            "cv2": _init_conv_bn(keys[4 + 2 * i], c_, c_, 3),
        })
    return params


# ------------------------------ pure-JAX reference ---------------------------


def _silu_ref(z):
    return z * jax.nn.sigmoid(z)


def _conv_bn_silu_ref(x, w, scale, bias):
    k = w.shape[-1]
    p = k // 2
    y = lax.conv_general_dilated(
        x, w, window_strides=(1, 1), padding=[(p, p), (p, p)],
        dimension_numbers=("NCHW", "OIHW", "NCHW"), precision=lax.Precision.HIGHEST)
    y = y * scale[None, :, None, None] + bias[None, :, None, None]
    return _silu_ref(y)


def c3_reference(x, params):
    y1 = _conv_bn_silu_ref(x, *params["cv1"])
    y2 = _conv_bn_silu_ref(x, *params["cv2"])
    m = y1
    for bp in params["m"]:
        t = _conv_bn_silu_ref(m, *bp["cv1"])
        t = _conv_bn_silu_ref(t, *bp["cv2"])
        m = m + t                                   # shortcut
    cat = jnp.concatenate([m, y2], axis=1)
    return _conv_bn_silu_ref(cat, *params["cv3"])


if __name__ == "__main__":
    key = jax.random.PRNGKey(0)
    kx, kp = jax.random.split(key)

    N, C1, C2, H, W, n = 2, 8, 8, 16, 16, 1
    x = jax.random.normal(kx, (N, C1, H, W), jnp.float32)
    params = init_c3_params(kp, C1, C2, n=n, e=0.5)

    out = c3_pallas(x, params)
    out = jax.block_until_ready(out)

    ref = c3_reference(x, params)
    # Kernel runs bf16-in / f32-accumulate on the MXU plus an approximate
    # reciprocal in SiLU; reference is full f32 HIGHEST -> loosened tolerance.
    np.testing.assert_allclose(np.asarray(out), np.asarray(ref), rtol=3e-2, atol=3e-2)
    print("KERNEL_OK")
</pallas_src>

<mosaic_0001>
module attributes {stable_mosaic.version = 11 : i64} {
  func.func @_c3_kernel(%arg0: i32, %arg1: memref<1x8x256xbf16, #tpu.memory_space<vmem>>, %arg2: memref<9x1x256xf32, #tpu.memory_space<vmem>>, %arg3: memref<8x8xbf16, #tpu.memory_space<vmem>>, %arg4: memref<8x1xf32, #tpu.memory_space<vmem>>, %arg5: memref<8x1xf32, #tpu.memory_space<vmem>>, %arg6: memref<8x8xbf16, #tpu.memory_space<vmem>>, %arg7: memref<8x1xf32, #tpu.memory_space<vmem>>, %arg8: memref<8x1xf32, #tpu.memory_space<vmem>>, %arg9: memref<1x8x8xbf16, #tpu.memory_space<vmem>>, %arg10: memref<1x8x1xf32, #tpu.memory_space<vmem>>, %arg11: memref<1x8x1xf32, #tpu.memory_space<vmem>>, %arg12: memref<9x8x8xbf16, #tpu.memory_space<vmem>>, %arg13: memref<1x8x1xf32, #tpu.memory_space<vmem>>, %arg14: memref<1x8x1xf32, #tpu.memory_space<vmem>>, %arg15: memref<8x16xbf16, #tpu.memory_space<vmem>>, %arg16: memref<8x1xf32, #tpu.memory_space<vmem>>, %arg17: memref<8x1xf32, #tpu.memory_space<vmem>>, %arg18: memref<1x8x256xf32, #tpu.memory_space<vmem>>) attributes {dimension_semantics = [#tpu.dimension_semantics<parallel>], iteration_bounds = array<i64: 2>, scalar_prefetch = 0 : i64, scratch_operands = 0 : i64, tpu.core_type = #tpu.core_type<tc>, window_params = [{transform_indices = @transform_0, window_bounds = array<i64: 1, 8, 256>}, {pipeline_mode = #tpu.pipeline_mode<synchronous>, transform_indices = @transform_1, window_bounds = array<i64: 9, 1, 256>}, {pipeline_mode = #tpu.pipeline_mode<synchronous>, transform_indices = @transform_2, window_bounds = array<i64: 8, 8>}, {pipeline_mode = #tpu.pipeline_mode<synchronous>, transform_indices = @transform_3, window_bounds = array<i64: 8, 1>}, {pipeline_mode = #tpu.pipeline_mode<synchronous>, transform_indices = @transform_4, window_bounds = array<i64: 8, 1>}, {pipeline_mode = #tpu.pipeline_mode<synchronous>, transform_indices = @transform_5, window_bounds = array<i64: 8, 8>}, {pipeline_mode = #tpu.pipeline_mode<synchronous>, transform_indices = @transform_6, window_bounds = array<i64: 8, 1>}, {pipeline_mode = #tpu.pipeline_mode<synchronous>, transform_indices = @transform_7, window_bounds = array<i64: 8, 1>}, {pipeline_mode = #tpu.pipeline_mode<synchronous>, transform_indices = @transform_8, window_bounds = array<i64: 1, 8, 8>}, {pipeline_mode = #tpu.pipeline_mode<synchronous>, transform_indices = @transform_9, window_bounds = array<i64: 1, 8, 1>}, {pipeline_mode = #tpu.pipeline_mode<synchronous>, transform_indices = @transform_10, window_bounds = array<i64: 1, 8, 1>}, {pipeline_mode = #tpu.pipeline_mode<synchronous>, transform_indices = @transform_11, window_bounds = array<i64: 9, 8, 8>}, {pipeline_mode = #tpu.pipeline_mode<synchronous>, transform_indices = @transform_12, window_bounds = array<i64: 1, 8, 1>}, {pipeline_mode = #tpu.pipeline_mode<synchronous>, transform_indices = @transform_13, window_bounds = array<i64: 1, 8, 1>}, {pipeline_mode = #tpu.pipeline_mode<synchronous>, transform_indices = @transform_14, window_bounds = array<i64: 8, 16>}, {pipeline_mode = #tpu.pipeline_mode<synchronous>, transform_indices = @transform_15, window_bounds = array<i64: 8, 1>}, {pipeline_mode = #tpu.pipeline_mode<synchronous>, transform_indices = @transform_16, window_bounds = array<i64: 8, 1>}, {transform_indices = @transform_17, window_bounds = array<i64: 1, 8, 256>}]} {
    %c0 = arith.constant 0 : index
    %c0_0 = arith.constant 0 : index
    %c0_1 = arith.constant 0 : index
    %0 = vector.load %arg1[%c0, %c0_0, %c0_1] : memref<1x8x256xbf16, #tpu.memory_space<vmem>>, vector<1x8x256xbf16>
    %1 = vector.shape_cast %0 : vector<1x8x256xbf16> to vector<8x256xbf16>
    %c0_2 = arith.constant 0 : index
    %c0_3 = arith.constant 0 : index
    %2 = vector.load %arg4[%c0_2, %c0_3] : memref<8x1xf32, #tpu.memory_space<vmem>>, vector<8x1xf32>
    %c0_4 = arith.constant 0 : index
    %c0_5 = arith.constant 0 : index
    %3 = vector.load %arg3[%c0_4, %c0_5] : memref<8x8xbf16, #tpu.memory_space<vmem>>, vector<8x8xbf16>
    %cst = arith.constant dense<0.000000e+00> : vector<8x256xf32>
    %4 = tpu.matmul %3, %1, %cst {dimension_numbers = #tpu.dot_dimension_numbers<[1], [0], [0], [1], [0, 0, 1, 1], [], []>} : vector<8x8xbf16>, vector<8x256xbf16>, vector<8x256xf32> -> vector<8x256xf32>
    %5 = vector.broadcast %2 : vector<8x1xf32> to vector<8x256xf32>
    %6 = arith.mulf %5, %4 : vector<8x256xf32>
    %c0_6 = arith.constant 0 : index
    %c0_7 = arith.constant 0 : index
    %7 = vector.load %arg5[%c0_6, %c0_7] : memref<8x1xf32, #tpu.memory_space<vmem>>, vector<8x1xf32>
    %8 = vector.broadcast %7 : vector<8x1xf32> to vector<8x256xf32>
    %9 = arith.addf %6, %8 : vector<8x256xf32>
    %cst_8 = arith.constant 0.000000e+00 : f32
    %10 = vector.broadcast %cst_8 : f32 to vector<8x256xf32>
    %11 = arith.subf %10, %9 : vector<8x256xf32>
    %12 = math.exp %11 : vector<8x256xf32>
    %cst_9 = arith.constant 1.000000e+00 : f32
    %13 = vector.broadcast %cst_9 : f32 to vector<8x256xf32>
    %14 = arith.addf %13, %12 : vector<8x256xf32>
    %15 = tpu.reciprocal %14 {approx = true} : vector<8x256xf32> -> vector<8x256xf32>
    %16 = arith.mulf %9, %15 : vector<8x256xf32>
    %c0_10 = arith.constant 0 : index
    %c0_11 = arith.constant 0 : index
    %17 = vector.load %arg7[%c0_10, %c0_11] : memref<8x1xf32, #tpu.memory_space<vmem>>, vector<8x1xf32>
    %c0_12 = arith.constant 0 : index
    %c0_13 = arith.constant 0 : index
    %18 = vector.load %arg6[%c0_12, %c0_13] : memref<8x8xbf16, #tpu.memory_space<vmem>>, vector<8x8xbf16>
    %cst_14 = arith.constant dense<0.000000e+00> : vector<8x256xf32>
    %19 = tpu.matmul %18, %1, %cst_14 {dimension_numbers = #tpu.dot_dimension_numbers<[1], [0], [0], [1], [0, 0, 1, 1], [], []>} : vector<8x8xbf16>, vector<8x256xbf16>, vector<8x256xf32> -> vector<8x256xf32>
    %20 = vector.broadcast %17 : vector<8x1xf32> to vector<8x256xf32>
    %21 = arith.mulf %20, %19 : vector<8x256xf32>
    %c0_15 = arith.constant 0 : index
    %c0_16 = arith.constant 0 : index
    %22 = vector.load %arg8[%c0_15, %c0_16] : memref<8x1xf32, #tpu.memory_space<vmem>>, vector<8x1xf32>
    %23 = vector.broadcast %22 : vector<8x1xf32> to vector<8x256xf32>
    %24 = arith.addf %21, %23 : vector<8x256xf32>
    %cst_17 = arith.constant 0.000000e+00 : f32
    %25 = vector.broadcast %cst_17 : f32 to vector<8x256xf32>
    %26 = arith.subf %25, %24 : vector<8x256xf32>
    %27 = math.exp %26 : vector<8x256xf32>
    %cst_18 = arith.constant 1.000000e+00 : f32
    %28 = vector.broadcast %cst_18 : f32 to vector<8x256xf32>
    %29 = arith.addf %28, %27 : vector<8x256xf32>
    %30 = tpu.reciprocal %29 {approx = true} : vector<8x256xf32> -> vector<8x256xf32>
    %31 = arith.mulf %24, %30 : vector<8x256xf32>
    %c0_i32 = arith.constant 0 : i32
    %32 = arith.truncf %16 : vector<8x256xf32> to vector<8x256xbf16>
    %33 = arith.index_cast %c0_i32 : i32 to index
    %c0_19 = arith.constant 0 : index
    %c0_20 = arith.constant 0 : index
    %34 = vector.load %arg10[%33, %c0_19, %c0_20] : memref<1x8x1xf32, #tpu.memory_space<vmem>>, vector<1x8x1xf32>
    %35 = vector.shape_cast %34 : vector<1x8x1xf32> to vector<8x1xf32>
    %36 = arith.index_cast %c0_i32 : i32 to index
    %c0_21 = arith.constant 0 : index
    %c0_22 = arith.constant 0 : index
    %37 = vector.load %arg9[%36, %c0_21, %c0_22] : memref<1x8x8xbf16, #tpu.memory_space<vmem>>, vector<1x8x8xbf16>
    %38 = vector.shape_cast %37 : vector<1x8x8xbf16> to vector<8x8xbf16>
    %cst_23 = arith.constant dense<0.000000e+00> : vector<8x256xf32>
    %39 = tpu.matmul %38, %32, %cst_23 {dimension_numbers = #tpu.dot_dimension_numbers<[1], [0], [0], [1], [0, 0, 1, 1], [], []>} : vector<8x8xbf16>, vector<8x256xbf16>, vector<8x256xf32> -> vector<8x256xf32>
    %40 = vector.broadcast %35 : vector<8x1xf32> to vector<8x256xf32>
    %41 = arith.mulf %40, %39 : vector<8x256xf32>
    %42 = arith.index_cast %c0_i32 : i32 to index
    %c0_24 = arith.constant 0 : index
    %c0_25 = arith.constant 0 : index
    %43 = vector.load %arg11[%42, %c0_24, %c0_25] : memref<1x8x1xf32, #tpu.memory_space<vmem>>, vector<1x8x1xf32>
    %44 = vector.shape_cast %43 : vector<1x8x1xf32> to vector<8x1xf32>
    %45 = vector.broadcast %44 : vector<8x1xf32> to vector<8x256xf32>
    %46 = arith.addf %41, %45 : vector<8x256xf32>
    %cst_26 = arith.constant 0.000000e+00 : f32
    %47 = vector.broadcast %cst_26 : f32 to vector<8x256xf32>
    %48 = arith.subf %47, %46 : vector<8x256xf32>
    %49 = math.exp %48 : vector<8x256xf32>
    %cst_27 = arith.constant 1.000000e+00 : f32
    %50 = vector.broadcast %cst_27 : f32 to vector<8x256xf32>
    %51 = arith.addf %50, %49 : vector<8x256xf32>
    %52 = tpu.reciprocal %51 {approx = true} : vector<8x256xf32> -> vector<8x256xf32>
    %53 = arith.mulf %46, %52 : vector<8x256xf32>
    %54 = arith.truncf %53 : vector<8x256xf32> to vector<8x256xbf16>
    %cst_28 = arith.constant 0.000000e+00 : f32
    %55 = vector.broadcast %cst_28 : f32 to vector<8x256xf32>
    %c17_i32 = arith.constant 17 : i32
    %56 = tpu.dynamic_rotate %53 by %c17_i32 dim 1 : vector<8x256xf32>, i32 -> vector<8x256xf32>
    %c0_29 = arith.constant 0 : index
    %c0_30 = arith.constant 0 : index
    %c0_31 = arith.constant 0 : index
    %57 = vector.load %arg2[%c0_29, %c0_30, %c0_31] : memref<9x1x256xf32, #tpu.memory_space<vmem>>, vector<1x1x256xf32>
    %58 = vector.shape_cast %57 : vector<1x1x256xf32> to vector<1x256xf32>
    %59 = vector.broadcast %58 : vector<1x256xf32> to vector<8x256xf32>
    %60 = arith.mulf %56, %59 : vector<8x256xf32>
    %61 = arith.truncf %60 : vector<8x256xf32> to vector<8x256xbf16>
    %c9_i32 = arith.constant 9 : i32
    %62 = arith.muli %c0_i32, %c9_i32 : i32
    %c0_i32_32 = arith.constant 0 : i32
    %63 = arith.addi %62, %c0_i32_32 : i32
    %64 = arith.index_cast %63 : i32 to index
    %c0_33 = arith.constant 0 : index
    %c0_34 = arith.constant 0 : index
    %65 = vector.load %arg12[%64, %c0_33, %c0_34] : memref<9x8x8xbf16, #tpu.memory_space<vmem>>, vector<1x8x8xbf16>
    %66 = vector.shape_cast %65 : vector<1x8x8xbf16> to vector<8x8xbf16>
    %cst_35 = arith.constant dense<0.000000e+00> : vector<8x256xf32>
    %67 = tpu.matmul %66, %61, %cst_35 {dimension_numbers = #tpu.dot_dimension_numbers<[1], [0], [0], [1], [0, 0, 1, 1], [], []>} : vector<8x8xbf16>, vector<8x256xbf16>, vector<8x256xf32> -> vector<8x256xf32>
    %68 = arith.addf %55, %67 : vector<8x256xf32>
    %c16_i32 = arith.constant 16 : i32
    %69 = tpu.dynamic_rotate %53 by %c16_i32 dim 1 : vector<8x256xf32>, i32 -> vector<8x256xf32>
    %c1 = arith.constant 1 : index
    %c0_36 = arith.constant 0 : index
    %c0_37 = arith.constant 0 : index
    %70 = vector.load %arg2[%c1, %c0_36, %c0_37] : memref<9x1x256xf32, #tpu.memory_space<vmem>>, vector<1x1x256xf32>
    %71 = vector.shape_cast %70 : vector<1x1x256xf32> to vector<1x256xf32>
    %72 = vector.broadcast %71 : vector<1x256xf32> to vector<8x256xf32>
    %73 = arith.mulf %69, %72 : vector<8x256xf32>
    %74 = arith.truncf %73 : vector<8x256xf32> to vector<8x256xbf16>
    %c9_i32_38 = arith.constant 9 : i32
    %75 = arith.muli %c0_i32, %c9_i32_38 : i32
    %c1_i32 = arith.constant 1 : i32
    %76 = arith.addi %75, %c1_i32 : i32
    %77 = arith.index_cast %76 : i32 to index
    %c0_39 = arith.constant 0 : index
    %c0_40 = arith.constant 0 : index
    %78 = vector.load %arg12[%77, %c0_39, %c0_40] : memref<9x8x8xbf16, #tpu.memory_space<vmem>>, vector<1x8x8xbf16>
    %79 = vector.shape_cast %78 : vector<1x8x8xbf16> to vector<8x8xbf16>
    %cst_41 = arith.constant dense<0.000000e+00> : vector<8x256xf32>
    %80 = tpu.matmul %79, %74, %cst_41 {dimension_numbers = #tpu.dot_dimension_numbers<[1], [0], [0], [1], [0, 0, 1, 1], [], []>} : vector<8x8xbf16>, vector<8x256xbf16>, vector<8x256xf32> -> vector<8x256xf32>
    %81 = arith.addf %68, %80 : vector<8x256xf32>
    %c15_i32 = arith.constant 15 : i32
    %82 = tpu.dynamic_rotate %53 by %c15_i32 dim 1 : vector<8x256xf32>, i32 -> vector<8x256xf32>
    %c2 = arith.constant 2 : index
    %c0_42 = arith.constant 0 : index
    %c0_43 = arith.constant 0 : index
    %83 = vector.load %arg2[%c2, %c0_42, %c0_43] : memref<9x1x256xf32, #tpu.memory_space<vmem>>, vector<1x1x256xf32>
    %84 = vector.shape_cast %83 : vector<1x1x256xf32> to vector<1x256xf32>
    %85 = vector.broadcast %84 : vector<1x256xf32> to vector<8x256xf32>
    %86 = arith.mulf %82, %85 : vector<8x256xf32>
    %87 = arith.truncf %86 : vector<8x256xf32> to vector<8x256xbf16>
    %c9_i32_44 = arith.constant 9 : i32
    %88 = arith.muli %c0_i32, %c9_i32_44 : i32
    %c2_i32 = arith.constant 2 : i32
    %89 = arith.addi %88, %c2_i32 : i32
    %90 = arith.index_cast %89 : i32 to index
    %c0_45 = arith.constant 0 : index
    %c0_46 = arith.constant 0 : index
    %91 = vector.load %arg12[%90, %c0_45, %c0_46] : memref<9x8x8xbf16, #tpu.memory_space<vmem>>, vector<1x8x8xbf16>
    %92 = vector.shape_cast %91 : vector<1x8x8xbf16> to vector<8x8xbf16>
    %cst_47 = arith.constant dense<0.000000e+00> : vector<8x256xf32>
    %93 = tpu.matmul %92, %87, %cst_47 {dimension_numbers = #tpu.dot_dimension_numbers<[1], [0], [0], [1], [0, 0, 1, 1], [], []>} : vector<8x8xbf16>, vector<8x256xbf16>, vector<8x256xf32> -> vector<8x256xf32>
    %94 = arith.addf %81, %93 : vector<8x256xf32>
    %c1_i32_48 = arith.constant 1 : i32
    %95 = tpu.dynamic_rotate %53 by %c1_i32_48 dim 1 : vector<8x256xf32>, i32 -> vector<8x256xf32>
    %c3 = arith.constant 3 : index
    %c0_49 = arith.constant 0 : index
    %c0_50 = arith.constant 0 : index
    %96 = vector.load %arg2[%c3, %c0_49, %c0_50] : memref<9x1x256xf32, #tpu.memory_space<vmem>>, vector<1x1x256xf32>
    %97 = vector.shape_cast %96 : vector<1x1x256xf32> to vector<1x256xf32>
    %98 = vector.broadcast %97 : vector<1x256xf32> to vector<8x256xf32>
    %99 = arith.mulf %95, %98 : vector<8x256xf32>
    %100 = arith.truncf %99 : vector<8x256xf32> to vector<8x256xbf16>
    %c9_i32_51 = arith.constant 9 : i32
    %101 = arith.muli %c0_i32, %c9_i32_51 : i32
    %c3_i32 = arith.constant 3 : i32
    %102 = arith.addi %101, %c3_i32 : i32
    %103 = arith.index_cast %102 : i32 to index
    %c0_52 = arith.constant 0 : index
    %c0_53 = arith.constant 0 : index
    %104 = vector.load %arg12[%103, %c0_52, %c0_53] : memref<9x8x8xbf16, #tpu.memory_space<vmem>>, vector<1x8x8xbf16>
    %105 = vector.shape_cast %104 : vector<1x8x8xbf16> to vector<8x8xbf16>
    %cst_54 = arith.constant dense<0.000000e+00> : vector<8x256xf32>
    %106 = tpu.matmul %105, %100, %cst_54 {dimension_numbers = #tpu.dot_dimension_numbers<[1], [0], [0], [1], [0, 0, 1, 1], [], []>} : vector<8x8xbf16>, vector<8x256xbf16>, vector<8x256xf32> -> vector<8x256xf32>
    %107 = arith.addf %94, %106 : vector<8x256xf32>
    %c9_i32_55 = arith.constant 9 : i32
    %108 = arith.muli %c0_i32, %c9_i32_55 : i32
    %c4_i32 = arith.constant 4 : i32
    %109 = arith.addi %108, %c4_i32 : i32
    %110 = arith.index_cast %109 : i32 to index
    %c0_56 = arith.constant 0 : index
    %c0_57 = arith.constant 0 : index
    %111 = vector.load %arg12[%110, %c0_56, %c0_57] : memref<9x8x8xbf16, #tpu.memory_space<vmem>>, vector<1x8x8xbf16>
    %112 = vector.shape_cast %111 : vector<1x8x8xbf16> to vector<8x8xbf16>
    %cst_58 = arith.constant dense<0.000000e+00> : vector<8x256xf32>
    %113 = tpu.matmul %112, %54, %cst_58 {dimension_numbers = #tpu.dot_dimension_numbers<[1], [0], [0], [1], [0, 0, 1, 1], [], []>} : vector<8x8xbf16>, vector<8x256xbf16>, vector<8x256xf32> -> vector<8x256xf32>
    %114 = arith.addf %107, %113 : vector<8x256xf32>
    %c255_i32 = arith.constant 255 : i32
    %115 = tpu.dynamic_rotate %53 by %c255_i32 dim 1 : vector<8x256xf32>, i32 -> vector<8x256xf32>
    %c5 = arith.constant 5 : index
    %c0_59 = arith.constant 0 : index
    %c0_60 = arith.constant 0 : index
    %116 = vector.load %arg2[%c5, %c0_59, %c0_60] : memref<9x1x256xf32, #tpu.memory_space<vmem>>, vector<1x1x256xf32>
    %117 = vector.shape_cast %116 : vector<1x1x256xf32> to vector<1x256xf32>
    %118 = vector.broadcast %117 : vector<1x256xf32> to vector<8x256xf32>
    %119 = arith.mulf %115, %118 : vector<8x256xf32>
    %120 = arith.truncf %119 : vector<8x256xf32> to vector<8x256xbf16>
    %c9_i32_61 = arith.constant 9 : i32
    %121 = arith.muli %c0_i32, %c9_i32_61 : i32
    %c5_i32 = arith.constant 5 : i32
    %122 = arith.addi %121, %c5_i32 : i32
    %123 = arith.index_cast %122 : i32 to index
    %c0_62 = arith.constant 0 : index
    %c0_63 = arith.constant 0 : index
    %124 = vector.load %arg12[%123, %c0_62, %c0_63] : memref<9x8x8xbf16, #tpu.memory_space<vmem>>, vector<1x8x8xbf16>
    %125 = vector.shape_cast %124 : vector<1x8x8xbf16> to vector<8x8xbf16>
    %cst_64 = arith.constant dense<0.000000e+00> : vector<8x256xf32>
    %126 = tpu.matmul %125, %120, %cst_64 {dimension_numbers = #tpu.dot_dimension_numbers<[1], [0], [0], [1], [0, 0, 1, 1], [], []>} : vector<8x8xbf16>, vector<8x256xbf16>, vector<8x256xf32> -> vector<8x256xf32>
    %127 = arith.addf %114, %126 : vector<8x256xf32>
    %c241_i32 = arith.constant 241 : i32
    %128 = tpu.dynamic_rotate %53 by %c241_i32 dim 1 : vector<8x256xf32>, i32 -> vector<8x256xf32>
    %c6 = arith.constant 6 : index
    %c0_65 = arith.constant 0 : index
    %c0_66 = arith.constant 0 : index
    %129 = vector.load %arg2[%c6, %c0_65, %c0_66] : memref<9x1x256xf32, #tpu.memory_space<vmem>>, vector<1x1x256xf32>
    %130 = vector.shape_cast %129 : vector<1x1x256xf32> to vector<1x256xf32>
    %131 = vector.broadcast %130 : vector<1x256xf32> to vector<8x256xf32>
    %132 = arith.mulf %128, %131 : vector<8x256xf32>
    %133 = arith.truncf %132 : vector<8x256xf32> to vector<8x256xbf16>
    %c9_i32_67 = arith.constant 9 : i32
    %134 = arith.muli %c0_i32, %c9_i32_67 : i32
    %c6_i32 = arith.constant 6 : i32
    %135 = arith.addi %134, %c6_i32 : i32
    %136 = arith.index_cast %135 : i32 to index
    %c0_68 = arith.constant 0 : index
    %c0_69 = arith.constant 0 : index
    %137 = vector.load %arg12[%136, %c0_68, %c0_69] : memref<9x8x8xbf16, #tpu.memory_space<vmem>>, vector<1x8x8xbf16>
    %138 = vector.shape_cast %137 : vector<1x8x8xbf16> to vector<8x8xbf16>
    %cst_70 = arith.constant dense<0.000000e+00> : vector<8x256xf32>
    %139 = tpu.matmul %138, %133, %cst_70 {dimension_numbers = #tpu.dot_dimension_numbers<[1], [0], [0], [1], [0, 0, 1, 1], [], []>} : vector<8x8xbf16>, vector<8x256xbf16>, vector<8x256xf32> -> vector<8x256xf32>
    %140 = arith.addf %127, %139 : vector<8x256xf32>
    %c240_i32 = arith.constant 240 : i32
    %141 = tpu.dynamic_rotate %53 by %c240_i32 dim 1 : vector<8x256xf32>, i32 -> vector<8x256xf32>
    %c7 = arith.constant 7 : index
    %c0_71 = arith.constant 0 : index
    %c0_72 = arith.constant 0 : index
    %142 = vector.load %arg2[%c7, %c0_71, %c0_72] : memref<9x1x256xf32, #tpu.memory_space<vmem>>, vector<1x1x256xf32>
    %143 = vector.shape_cast %142 : vector<1x1x256xf32> to vector<1x256xf32>
    %144 = vector.broadcast %143 : vector<1x256xf32> to vector<8x256xf32>
    %145 = arith.mulf %141, %144 : vector<8x256xf32>
    %146 = arith.truncf %145 : vector<8x256xf32> to vector<8x256xbf16>
    %c9_i32_73 = arith.constant 9 : i32
    %147 = arith.muli %c0_i32, %c9_i32_73 : i32
    %c7_i32 = arith.constant 7 : i32
    %148 = arith.addi %147, %c7_i32 : i32
    %149 = arith.index_cast %148 : i32 to index
    %c0_74 = arith.constant 0 : index
    %c0_75 = arith.constant 0 : index
    %150 = vector.load %arg12[%149, %c0_74, %c0_75] : memref<9x8x8xbf16, #tpu.memory_space<vmem>>, vector<1x8x8xbf16>
    %151 = vector.shape_cast %150 : vector<1x8x8xbf16> to vector<8x8xbf16>
    %cst_76 = arith.constant dense<0.000000e+00> : vector<8x256xf32>
    %152 = tpu.matmul %151, %146, %cst_76 {dimension_numbers = #tpu.dot_dimension_numbers<[1], [0], [0], [1], [0, 0, 1, 1], [], []>} : vector<8x8xbf16>, vector<8x256xbf16>, vector<8x256xf32> -> vector<8x256xf32>
    %153 = arith.addf %140, %152 : vector<8x256xf32>
    %c239_i32 = arith.constant 239 : i32
    %154 = tpu.dynamic_rotate %53 by %c239_i32 dim 1 : vector<8x256xf32>, i32 -> vector<8x256xf32>
    %c8 = arith.constant 8 : index
    %c0_77 = arith.constant 0 : index
    %c0_78 = arith.constant 0 : index
    %155 = vector.load %arg2[%c8, %c0_77, %c0_78] : memref<9x1x256xf32, #tpu.memory_space<vmem>>, vector<1x1x256xf32>
    %156 = vector.shape_cast %155 : vector<1x1x256xf32> to vector<1x256xf32>
    %157 = vector.broadcast %156 : vector<1x256xf32> to vector<8x256xf32>
    %158 = arith.mulf %154, %157 : vector<8x256xf32>
    %159 = arith.truncf %158 : vector<8x256xf32> to vector<8x256xbf16>
    %c9_i32_79 = arith.constant 9 : i32
    %160 = arith.muli %c0_i32, %c9_i32_79 : i32
    %c8_i32 = arith.constant 8 : i32
    %161 = arith.addi %160, %c8_i32 : i32
    %162 = arith.index_cast %161 : i32 to index
    %c0_80 = arith.constant 0 : index
    %c0_81 = arith.constant 0 : index
    %163 = vector.load %arg12[%162, %c0_80, %c0_81] : memref<9x8x8xbf16, #tpu.memory_space<vmem>>, vector<1x8x8xbf16>
    %164 = vector.shape_cast %163 : vector<1x8x8xbf16> to vector<8x8xbf16>
    %cst_82 = arith.constant dense<0.000000e+00> : vector<8x256xf32>
    %165 = tpu.matmul %164, %159, %cst_82 {dimension_numbers = #tpu.dot_dimension_numbers<[1], [0], [0], [1], [0, 0, 1, 1], [], []>} : vector<8x8xbf16>, vector<8x256xbf16>, vector<8x256xf32> -> vector<8x256xf32>
    %166 = arith.addf %153, %165 : vector<8x256xf32>
    %167 = arith.index_cast %c0_i32 : i32 to index
    %c0_83 = arith.constant 0 : index
    %c0_84 = arith.constant 0 : index
    %168 = vector.load %arg13[%167, %c0_83, %c0_84] : memref<1x8x1xf32, #tpu.memory_space<vmem>>, vector<1x8x1xf32>
    %169 = vector.shape_cast %168 : vector<1x8x1xf32> to vector<8x1xf32>
    %170 = vector.broadcast %169 : vector<8x1xf32> to vector<8x256xf32>
    %171 = arith.mulf %170, %166 : vector<8x256xf32>
    %172 = arith.index_cast %c0_i32 : i32 to index
    %c0_85 = arith.constant 0 : index
    %c0_86 = arith.constant 0 : index
    %173 = vector.load %arg14[%172, %c0_85, %c0_86] : memref<1x8x1xf32, #tpu.memory_space<vmem>>, vector<1x8x1xf32>
    %174 = vector.shape_cast %173 : vector<1x8x1xf32> to vector<8x1xf32>
    %175 = vector.broadcast %174 : vector<8x1xf32> to vector<8x256xf32>
    %176 = arith.addf %171, %175 : vector<8x256xf32>
    %cst_87 = arith.constant 0.000000e+00 : f32
    %177 = vector.broadcast %cst_87 : f32 to vector<8x256xf32>
    %178 = arith.subf %177, %176 : vector<8x256xf32>
    %179 = math.exp %178 : vector<8x256xf32>
    %cst_88 = arith.constant 1.000000e+00 : f32
    %180 = vector.broadcast %cst_88 : f32 to vector<8x256xf32>
    %181 = arith.addf %180, %179 : vector<8x256xf32>
    %182 = tpu.reciprocal %181 {approx = true} : vector<8x256xf32> -> vector<8x256xf32>
    %183 = arith.mulf %176, %182 : vector<8x256xf32>
    %184 = arith.addf %16, %183 : vector<8x256xf32>
    %c1_i32_89 = arith.constant 1 : i32
    %185 = tpu.concatenate %184, %31 in 0 : vector<8x256xf32>, vector<8x256xf32> -> vector<16x256xf32>
    %186 = arith.truncf %185 : vector<16x256xf32> to vector<16x256xbf16>
    %c0_90 = arith.constant 0 : index
    %c0_91 = arith.constant 0 : index
    %187 = vector.load %arg15[%c0_90, %c0_91] : memref<8x16xbf16, #tpu.memory_space<vmem>>, vector<8x16xbf16>
    %cst_92 = arith.constant dense<0.000000e+00> : vector<8x256xf32>
    %188 = tpu.matmul %187, %186, %cst_92 {dimension_numbers = #tpu.dot_dimension_numbers<[1], [0], [0], [1], [0, 0, 1, 1], [], []>} : vector<8x16xbf16>, vector<16x256xbf16>, vector<8x256xf32> -> vector<8x256xf32>
    %c0_93 = arith.constant 0 : index
    %c0_94 = arith.constant 0 : index
    %189 = vector.load %arg16[%c0_93, %c0_94] : memref<8x1xf32, #tpu.memory_space<vmem>>, vector<8x1xf32>
    %190 = vector.broadcast %189 : vector<8x1xf32> to vector<8x256xf32>
    %191 = arith.mulf %190, %188 : vector<8x256xf32>
    %c0_95 = arith.constant 0 : index
    %c0_96 = arith.constant 0 : index
    %192 = vector.load %arg17[%c0_95, %c0_96] : memref<8x1xf32, #tpu.memory_space<vmem>>, vector<8x1xf32>
    %193 = vector.broadcast %192 : vector<8x1xf32> to vector<8x256xf32>
    %194 = arith.addf %191, %193 : vector<8x256xf32>
    %cst_97 = arith.constant 0.000000e+00 : f32
    %195 = vector.broadcast %cst_97 : f32 to vector<8x256xf32>
    %196 = arith.subf %195, %194 : vector<8x256xf32>
    %197 = math.exp %196 : vector<8x256xf32>
    %cst_98 = arith.constant 1.000000e+00 : f32
    %198 = vector.broadcast %cst_98 : f32 to vector<8x256xf32>
    %199 = arith.addf %198, %197 : vector<8x256xf32>
    %200 = tpu.reciprocal %199 {approx = true} : vector<8x256xf32> -> vector<8x256xf32>
    %201 = arith.mulf %194, %200 : vector<8x256xf32>
    %c0_99 = arith.constant 0 : index
    %c0_100 = arith.constant 0 : index
    %c0_101 = arith.constant 0 : index
    %202 = vector.load %arg18[%c0_99, %c0_100, %c0_101] : memref<1x8x256xf32, #tpu.memory_space<vmem>>, vector<1x8x256xf32>
    %203 = vector.shape_cast %202 : vector<1x8x256xf32> to vector<8x256xf32>
    %204 = vector.shape_cast %201 : vector<8x256xf32> to vector<1x8x256xf32>
    tpu.vector_store %arg18[%c0_99, %c0_100, %c0_101], %204 {strides = array<i32>} : memref<1x8x256xf32, #tpu.memory_space<vmem>>, vector<1x8x256xf32>,
    return
  }
  func.func @transform_0(%arg0: i32) -> (i32, i32, i32) {
    %c0_i32 = arith.constant 0 : i32
    %c0_i32_0 = arith.constant 0 : i32
    %c0_i32_1 = arith.constant 0 : i32
    return %arg0, %c0_i32, %c0_i32_0 : i32, i32, i32
  }
  func.func @transform_1(%arg0: i32) -> (i32, i32, i32) {
    %c0_i32 = arith.constant 0 : i32
    %c0_i32_0 = arith.constant 0 : i32
    %c0_i32_1 = arith.constant 0 : i32
    %c0_i32_2 = arith.constant 0 : i32
    return %c0_i32, %c0_i32_0, %c0_i32_1 : i32, i32, i32
  }
  func.func @transform_2(%arg0: i32) -> (i32, i32) {
    %c0_i32 = arith.constant 0 : i32
    %c0_i32_0 = arith.constant 0 : i32
    %c0_i32_1 = arith.constant 0 : i32
    return %c0_i32, %c0_i32_0 : i32, i32
  }
  func.func @transform_3(%arg0: i32) -> (i32, i32) {
    %c0_i32 = arith.constant 0 : i32
    %c0_i32_0 = arith.constant 0 : i32
    %c0_i32_1 = arith.constant 0 : i32
    return %c0_i32, %c0_i32_0 : i32, i32
  }
  func.func @transform_4(%arg0: i32) -> (i32, i32) {
    %c0_i32 = arith.constant 0 : i32
    %c0_i32_0 = arith.constant 0 : i32
    %c0_i32_1 = arith.constant 0 : i32
    return %c0_i32, %c0_i32_0 : i32, i32
  }
  func.func @transform_5(%arg0: i32) -> (i32, i32) {
    %c0_i32 = arith.constant 0 : i32
    %c0_i32_0 = arith.constant 0 : i32
    %c0_i32_1 = arith.constant 0 : i32
    return %c0_i32, %c0_i32_0 : i32, i32
  }
  func.func @transform_6(%arg0: i32) -> (i32, i32) {
    %c0_i32 = arith.constant 0 : i32
    %c0_i32_0 = arith.constant 0 : i32
    %c0_i32_1 = arith.constant 0 : i32
    return %c0_i32, %c0_i32_0 : i32, i32
  }
  func.func @transform_7(%arg0: i32) -> (i32, i32) {
    %c0_i32 = arith.constant 0 : i32
    %c0_i32_0 = arith.constant 0 : i32
    %c0_i32_1 = arith.constant 0 : i32
    return %c0_i32, %c0_i32_0 : i32, i32
  }
  func.func @transform_8(%arg0: i32) -> (i32, i32, i32) {
    %c0_i32 = arith.constant 0 : i32
    %c0_i32_0 = arith.constant 0 : i32
    %c0_i32_1 = arith.constant 0 : i32
    %c0_i32_2 = arith.constant 0 : i32
    return %c0_i32, %c0_i32_0, %c0_i32_1 : i32, i32, i32
  }
  func.func @transform_9(%arg0: i32) -> (i32, i32, i32) {
    %c0_i32 = arith.constant 0 : i32
    %c0_i32_0 = arith.constant 0 : i32
    %c0_i32_1 = arith.constant 0 : i32
    %c0_i32_2 = arith.constant 0 : i32
    return %c0_i32, %c0_i32_0, %c0_i32_1 : i32, i32, i32
  }
  func.func @transform_10(%arg0: i32) -> (i32, i32, i32) {
    %c0_i32 = arith.constant 0 : i32
    %c0_i32_0 = arith.constant 0 : i32
    %c0_i32_1 = arith.constant 0 : i32
    %c0_i32_2 = arith.constant 0 : i32
    return %c0_i32, %c0_i32_0, %c0_i32_1 : i32, i32, i32
  }
  func.func @transform_11(%arg0: i32) -> (i32, i32, i32) {
    %c0_i32 = arith.constant 0 : i32
    %c0_i32_0 = arith.constant 0 : i32
    %c0_i32_1 = arith.constant 0 : i32
    %c0_i32_2 = arith.constant 0 : i32
    return %c0_i32, %c0_i32_0, %c0_i32_1 : i32, i32, i32
  }
  func.func @transform_12(%arg0: i32) -> (i32, i32, i32) {
    %c0_i32 = arith.constant 0 : i32
    %c0_i32_0 = arith.constant 0 : i32
    %c0_i32_1 = arith.constant 0 : i32
    %c0_i32_2 = arith.constant 0 : i32
    return %c0_i32, %c0_i32_0, %c0_i32_1 : i32, i32, i32
  }
  func.func @transform_13(%arg0: i32) -> (i32, i32, i32) {
    %c0_i32 = arith.constant 0 : i32
    %c0_i32_0 = arith.constant 0 : i32
    %c0_i32_1 = arith.constant 0 : i32
    %c0_i32_2 = arith.constant 0 : i32
    return %c0_i32, %c0_i32_0, %c0_i32_1 : i32, i32, i32
  }
  func.func @transform_14(%arg0: i32) -> (i32, i32) {
    %c0_i32 = arith.constant 0 : i32
    %c0_i32_0 = arith.constant 0 : i32
    %c0_i32_1 = arith.constant 0 : i32
    return %c0_i32, %c0_i32_0 : i32, i32
  }
  func.func @transform_15(%arg0: i32) -> (i32, i32) {
    %c0_i32 = arith.constant 0 : i32
    %c0_i32_0 = arith.constant 0 : i32
    %c0_i32_1 = arith.constant 0 : i32
    return %c0_i32, %c0_i32_0 : i32, i32
  }
  func.func @transform_16(%arg0: i32) -> (i32, i32) {
    %c0_i32 = arith.constant 0 : i32
    %c0_i32_0 = arith.constant 0 : i32
    %c0_i32_1 = arith.constant 0 : i32
    return %c0_i32, %c0_i32_0 : i32, i32
  }
  func.func @transform_17(%arg0: i32) -> (i32, i32, i32) {
    %c0_i32 = arith.constant 0 : i32
    %c0_i32_0 = arith.constant 0 : i32
    %c0_i32_1 = arith.constant 0 : i32
    return %arg0, %c0_i32, %c0_i32_0 : i32, i32, i32
  }
}

</mosaic_0001>

<bundles_post_ra>
// kernel: tpu_custom_call.1
= control target key start
LH: loop header
LB: loop body
LE: loop exit
PB: predicated region body
PF: predicated region fallthrough
CT: control target
= control target key end

     0   :  { %s2322_s0 = inlined_call_operand.vmem [shape: bf16[2,8,256], index: 0, kind: input, shape index: {}]   ;;  %s2323_s1 = inlined_call_operand.vmem [shape: f32[9,1,256], index: 1, kind: input, shape index: {}]   ;;  %s2324_s2 = inlined_call_operand.vmem [shape: bf16[8,8], index: 2, kind: input, shape index: {}]   ;;  %s2325_s3 = inlined_call_operand.vmem [shape: f32[8,1], index: 3, kind: input, shape index: {}]   ;;  %s2326_s4 = inlined_call_operand.vmem [shape: f32[8,1], index: 4, kind: input, shape index: {}]   ;;  %s2327_s5 = inlined_call_operand.vmem [shape: bf16[8,8], index: 5, kind: input, shape index: {}]   ;;  %s2328_s6 = inlined_call_operand.vmem [shape: f32[8,1], index: 6, kind: input, shape index: {}]   ;;  %s2329_s7 = inlined_call_operand.vmem [shape: f32[8,1], index: 7, kind: input, shape index: {}]   ;;  %s2330_s8 = inlined_call_operand.vmem [shape: bf16[1,8,8], index: 8, kind: input, shape index: {}]   ;;  %s2331_s9 = inlined_call_operand.vmem [shape: f32[1,8,1], index: 9, kind: input, shape index: {}]   ;;  %s2332_s10 = inlined_call_operand.vmem [shape: f32[1,8,1], index: 10, kind: input, shape index: {}]   ;;  %s2333_s11 = inlined_call_operand.vmem [shape: bf16[9,8,8], index: 11, kind: input, shape index: {}]   ;;  %s2334_s12 = inlined_call_operand.vmem [shape: f32[1,8,1], index: 12, kind: input, shape index: {}]   ;;  %s2335_s13 = inlined_call_operand.vmem [shape: f32[1,8,1], index: 13, kind: input, shape index: {}]   ;;  %s2336_s14 = inlined_call_operand.vmem [shape: bf16[8,16], index: 14, kind: input, shape index: {}]   ;;  %s2337_s15 = inlined_call_operand.vmem [shape: f32[8,1], index: 15, kind: input, shape index: {}]   ;;  %s2338_s16 = inlined_call_operand.vmem [shape: f32[8,1], index: 16, kind: input, shape index: {}]   ;;  %s2339_s17 = inlined_call_operand.hbm [shape: f32[2,8,256], index: 17, kind: output, shape index: {}]  }
   0x1   :  { %2346 = sst [smem:[#allocation9_spill]] %s2322_s0 }
   0x2   :  { %2347 = sst [smem:[#allocation10_spill]] %s2323_s1 }
   0x3   :  { %2348 = sst [smem:[#allocation11_spill]] %s2324_s2 }
   0x4   :  { %22 = vsyncpa [#allocation3], 0 }
   0x5   :  { %24 = vsyncpa [#allocation3 + $0x1], 0  ;;  %s1989_s24 = smov 0   ;;  %s1991_s25 = smov 0  }
   0x6   :  { %s1993_s26 = smov 0   ;;  %s1995_s27 = smov 0  }
   0x7 LB: > { %2349 = sst [smem:[#allocation5_spill]] %s1883_s26  ;;  %s2010_s28 = sadd.s32 4294967295, %s1887_s27   ;;  %s1887_s27 = sphi %s1995_s27, %s2360_s27   ;;  %s1883_s26 = sphi %s1993_s26, %s2362_s26   ;;  %s1879_s25 = sphi %s1991_s25, %s2364_s25   ;;  %s1875_s24 = sphi %s1989_s24, %s2363_s24  }
   0x8   : > { %s1647_s29 = sadd.s32 4294967294, %s1887_s27   ;;  %s2014_s0 = sadd.s32 1, %s1887_s27  }
   0x9   : > { %2350 = sst [smem:[#allocation6_spill]] %s2014_s0  ;;  %s399_s30 = sadd.s32 1, %s1883_s26 }
   0xa   : > { %s396_s18 = ssub.s32 %s1887_s27, %s2014_s0  ;;  %p409_p0 = scmp.ne.s32.totalorder %s1883_s26, %s1879_s25 }
   0xb   : > { %p397_p1 = scmp.eq.s32.totalorder %s396_s18, 0  ;;  %p410_p2 = scmp.eq.s32.totalorder %s2010_s28, 1 }
   0xc   : > { %p415_p3 = scmp.ne.s32.totalorder %s1879_s25, %s1875_s24  ;;  %p416_p4 = scmp.eq.s32.totalorder %s1647_s29, 1 }
   0xd   : > { %s2025_s19 = scalar_select %p397_p1, %s1883_s26, %s399_s30  }
   0xe   : > { %p2027_p5 = por %p410_p2, %p409_p0  ;;  %p2031_p6 = por %p416_p4, %p415_p3 }
   0xf   : > { %2351 = sst [smem:[#allocation7_spill]] %s2025_s19  ;;  %p1650_p7 = scmp.ge.s32.totalorder %s1887_s27, 1 }
  0x10   : > { %s2353_s20 = scalar_select %p2031_p6, 1, 0 }
  0x11   : > { %p490_p8 = scmp.lt.s32.totalorder %s1887_s27, 3 }
  0x12   : > { %2354 = sst [smem:[#allocation8_spill]] %s2353_s20 }
  0x13   : > { %p491_p9 = pnand %p1650_p7, %p490_p8 }
  0x14   : > { %p542_p10 = scmp.lt.s32.totalorder (!%p491_p9), %s2010_s28, 1  ;;  %v1889_v0 = vmov (!%p491_p9), 0   ;;  %v549_v1 = vld [vmem:[%s2325_s3] sm:$0xff] (!%p491_p9)  ;;  %s2355_s0 = sld [smem:[#allocation9_spill]] (!%p491_p9)  ;;  %vm560_vm0 = vcmask (!%p491_p9), 1043456   ;;  %vm556_vm1 = vcmask (!%p491_p9), 64512  }
  0x15   : > { %494 = sbr.rel (%p491_p9) target bundleno = 1253 (0x4e5), region = 88  ;;  %599 = vmatprep.mubr.bf16.mxu0 (!%p491_p9), %v1889_v0  ;;  %1781 = vset.pattern.permute.xlu0 (!%p491_p9), %v1889_v0  ;;  %v615_v2 = vld [vmem:[%s2326_s4] sm:$0xff] (!%p491_p9)  ;;  %s2356_s2 = sld [smem:[#allocation11_spill]] (!%p491_p9)  ;;  %vm1498_vm10 = vcmask (!%p491_p9), 130048  }
  0x16   : > { %610 = vperm.xlu0 (!%p491_p9), %1781, %v549_v1   ;;  %1782 = vset.pattern.permute.xlu1 (!%p491_p9), %v1889_v0  ;;  %v636_v8 = vld [vmem:[%s2327_s5] sm:$0xf] (!%p491_p9)  ;;  %s1890_s21 = smov (!%p491_p9), 15   ;;  %s1891_s22 = smov (!%p491_p9), 1  }
  0x17   : > { %1010 = vmatprep.mubr.bf16.mxu1 (!%p491_p9), %v1889_v0  ;;  %v710_v9 = vld [vmem:[%s2331_s9] sm:$0xff] (!%p491_p9)  ;;  %s1892_s26 = smov (!%p491_p9), 127   ;;  %s1894_s19 = smov (!%p491_p9), 16  }
  0x18   : > { %764 = vperm.xlu1 (!%p491_p9), %1782, %v710_v9   ;;  %v769_v10 = vld [vmem:[%s2332_s10] sm:$0xff] (!%p491_p9)  ;;  %s1897_s29 = smov (!%p491_p9), 111  }
  0x19   : > { %v711_v36 = vld [vmem:[%s2330_s8] sm:$0xf] (!%p491_p9) }
  0x1a   : > { %618 = vperm.xlu0 (!%p491_p9), %1781, %v615_v2   ;;  %v1465_v63 = vld [vmem:[%s2334_s12] sm:$0xff] (!%p491_p9) }
  0x1b   : > { %v550_v7 = vld [vmem:[%s2356_s2] sm:$0xf] (!%p491_p9) }
  0x1c   : > { %s543_s23 = scalar_select %p542_p10, %s2010_s28, 1  ;;  %772 = vperm.xlu1 %1782, %v769_v10   ;;  %v635_v1 = vld [vmem:[%s2328_s6] sm:$0xff] }
  0x1d   : > { %v1473_v2 = vld [vmem:[%s2335_s13] sm:$0xff] }
  0x1e   : > { %s1701_s18 = sshll.u32 %s543_s23, 3  ;;  %s1896_s23 = smov 17  }
  0x1f   : > { %s546_s20 = scalar_lea.vmem %s2355_s0, %s1701_s18  ;;  %s1893_s0 = smov 113  }
  0x20   : > { %v548_v3 = vld [vmem:[%s546_s20] sm:$0xff]  ;;  %s1895_s20 = smov 112  }
  0x21   : > { %v1655_v4 = vcombine.high %v548_v3, %v548_v3  ;;  %v1654_v5 = vcombine.low %v548_v3, %v548_v3  ;;  %v688_v3 = vld [vmem:[%s2329_s7] sm:$0xff] }
  0x23   : > { %1656 = vmatprep.subr.msk.bf16.mxu0 %vm560_vm0, %v1655_v4  ;;  %v562_v6 = vsel %vm560_vm0, %v1654_v5, 0  ;;  %v1551_v5 = vld [vmem:[%s2338_s16] sm:$0xff] }
  0x24   : > { %568 = vmatpush1.bf16.msra.mxu0 %v562_v6 }
  0x25   : > { %1658 = vmatprep.subr.msk.bf16.mxu0 %vm560_vm0, %v1655_v4  ;;  %v1543_v4 = vld [vmem:[%s2337_s15] sm:$0xff] }
  0x27   : > { %1657 = vmatmul.mubr.msk.bf16.vlgmr.msra.gmra.mrb[0].mxu0 %vm556_vm1, %v550_v7 }
  0x28   : > { %641 = vmatpush1.bf16.msra.mxu0 %v562_v6  ;;  %672 = vmatprep.mubr.bf16.mxu0 %v1889_v0  ;;  %v795_v6 = vlaneseq }
  0x2a   : > { %v803_v7 = vshrl.u32 %v795_v6, 7 }
  0x2c   : > { %v2130_v9 = vsub.s32 0, %v803_v7  ;;  %v2132_v10 = vsub.s32 1, %v803_v7 }
  0x2f   : > { %1659 = vmatmul.mubr.msk.bf16.vlgmr.msra.gmra.mrb[4].mxu0 %vm556_vm1, %v636_v8  ;;  %v2128_v8 = vand.u32 127, %v795_v6 }
  0x30   : > { %753 = vmatprep.mubr.bf16.mxu0 %v1889_v0 }
  0x31   : > { %vm947_vm2 = vcmp.lt.s32.totalorder %v2128_v8, 15  ;;  %vm1025_vm3 = vcmp.lt.s32.totalorder %v2128_v8, 1  ;;  %vm1157_vm4 = vcmp.lt.s32.totalorder %v2128_v8, 127  ;;  %vm821_vm5 = vcmp.lt.s32.totalorder %v2128_v8, 16 }
  0x32   : > { %vm797_vm6 = vcmp.lt.s32.totalorder %v2128_v8, 17  ;;  %vm1235_vm7 = vcmp.lt.s32.totalorder %v2128_v8, 113  ;;  %vm1313_vm8 = vcmp.lt.s32.totalorder %v2128_v8, 112  ;;  %vm1391_vm9 = vcmp.lt.s32.totalorder %v2128_v8, 111 }
  0x95   : > { %v611_v11 = vpop.permute.xlu0 %610 }
  0x97   : > { %v765_v41 = vpop.permute.xlu1 %764 }
  0x99   : > { %v619_v15 = vpop.permute.xlu0 %618 }
  0x9b   : > { %v773_v45 = vpop.permute.xlu1 %772 }
  0xfa   : > { %v601_v12 = vpop.f32.mrb[0].mxu0 }
  0xfb   : > { %v613_v13 = vmul.f32 %v611_v11, %v601_v12  ;;  %v603_v14 = vpop.f32.mrb[1].mxu0 }
  0xfc   : > { %v614_v16 = vmul.f32 %v611_v11, %v603_v14  ;;  %v605_v17 = vpop.f32.mrb[2].mxu0 }
  0xfd   : > { %v621_v18 = vadd.f32 %v619_v15, %v613_v13  ;;  %v606_v19 = vpop.f32.mrb[3].mxu0 }
  0xfe   : > { %v622_v20 = vadd.f32 %v619_v15, %v614_v16 }
  0xff   : > { %v623_v21 = vsub.f32 0.0, %v621_v18 }
 0x100   : > { %v624_v22 = vsub.f32 0.0, %v622_v20 }
 0x101   : > { %v625_v23 = vmul.f32 1.442695, %v623_v21 }
 0x102   : > { %v627_v24 = vmul.f32 1.442695, %v624_v22  ;;  %v2086_v37 = vpop.f32.mrb[4].mxu0 }
 0x103   : > { %1785 = vpow2.f32 %v625_v23  ;;  %v2088_v38 = vpop.f32.mrb[5].mxu0 }
 0x104   : > { %1787 = vpow2.f32 %v627_v24  ;;  %v678_v39 = vpop.f32.mrb[6].mxu0 }
 0x105   : > { %v679_v40 = vpop.f32.mrb[7].mxu0 }
 0x10d   : > { %v1786_v25 = vpop.eup %1785 }
 0x10e   : > { %v1788_v26 = vpop.eup %1787  ;;  %v629_v27 = vadd.f32 1.0, %v1786_v25 }
 0x10f   : > { %v630_v28 = vadd.f32 1.0, %v1788_v26 }
 0x110   : > { %1789 = vrcp.f32 %v629_v27 }
 0x111   : > { %1791 = vrcp.f32 %v630_v28 }
 0x11a   : > { %v1790_v29 = vpop.eup %1789 }
 0x11b   : > { %v1792_v30 = vpop.eup %1791  ;;  %v2071_v31 = vmul.f32 %v1790_v29, %v621_v18 }
 0x11c   : > { %v2073_v32 = vmul.f32 %v1792_v30, %v622_v20 }
 0x11d   : > { %v708_v33 = vpack.c.bf16 %v2071_v31, %v2071_v31 }
 0x11e   : > { %v709_v34 = vpack.c.bf16 %v2073_v32, %v2073_v32 }
 0x11f   : > { %v716_v35 = vsel %vm560_vm0, %v708_v33, 0 }
 0x120   : > { %1660 = vmatprep.subr.msk.bf16.mxu0 %vm560_vm0, %v709_v34 }
 0x121   : > { %722 = vmatpush1.bf16.msra.mxu0 %v716_v35  ;;  %v1669_v35 = vld [vmem:[%s2333_s11 + $0x8] sm:$0xf] }
 0x124   : > { %1661 = vmatmul.mubr.msk.bf16.vlgmr.msra.gmra.mrb[8].mxu0 %vm556_vm1, %v711_v36 }
 0x125   : > { %884 = vmatprep.mubr.bf16.mxu0 %v1889_v0 }
 0x1f7   : > { %v755_v42 = vpop.f32.mrb[8].mxu0 }
 0x1f8   : > { %v767_v43 = vmul.f32 %v765_v41, %v755_v42  ;;  %v757_v44 = vpop.f32.mrb[9].mxu0 }
 0x1f9   : > { %v768_v46 = vmul.f32 %v765_v41, %v757_v44  ;;  %v759_v47 = vpop.f32.mrb[10].mxu0 }
 0x1fa   : > { %v775_v48 = vadd.f32 %v773_v45, %v767_v43  ;;  %v760_v49 = vpop.f32.mrb[11].mxu0 }
 0x1fb   : > { %v776_v50 = vadd.f32 %v773_v45, %v768_v46 }
 0x1fc   : > { %v777_v51 = vsub.f32 0.0, %v775_v48 }
 0x1fd   : > { %v778_v52 = vsub.f32 0.0, %v776_v50 }
 0x1fe   : > { %v779_v53 = vmul.f32 1.442695, %v777_v51 }
 0x1ff   : > { %v781_v54 = vmul.f32 1.442695, %v778_v52 }
 0x200   : > { %1793 = vpow2.f32 %v779_v53 }
 0x201   : > { %1795 = vpow2.f32 %v781_v54 }
 0x20a   : > { %v1794_v55 = vpop.eup %1793 }
 0x20b   : > { %v1796_v56 = vpop.eup %1795  ;;  %v783_v57 = vadd.f32 1.0, %v1794_v55 }
 0x20c   : > { %v784_v58 = vadd.f32 1.0, %v1796_v56 }
 0x20d   : > { %1797 = vrcp.f32 %v783_v57 }
 0x20e   : > { %1799 = vrcp.f32 %v784_v58 }
 0x217   : > { %v1798_v59 = vpop.eup %1797 }
 0x218   : > { %v1800_v60 = vpop.eup %1799  ;;  %v2090_v61 = vmul.f32 %v1798_v59, %v775_v48 }
 0x219   : > { %v2092_v62 = vmul.f32 %v1800_v60, %v776_v50  ;;  %v1673_v60 = vld [vmem:[%s2333_s11 + $0xc] sm:$0xf] }
 0x21a   : > { %943 = vrot.lane.b32.xlu0 %v2090_v61, %s1890_s21  ;;  %v789_v55 = vpack.c.bf16 %v2090_v61, %v2090_v61 }
 0x21b   : > { %945 = vrot.lane.b32.xlu1 %v2092_v62, %s1890_s21  ;;  %v790_v42 = vpack.c.bf16 %v2092_v62, %v2092_v62 }
 0x21e   : > { %1021 = vrot.lane.b32.xlu0 %v2090_v61, %s1891_s22 }
 0x21f   : > { %1023 = vrot.lane.b32.xlu1 %v2092_v62, %s1891_s22  ;;  %s539_s22 = sand.u32 1, %s1879_s25  }
 0x220   : > { %s1574_s21 = scalar_lea.sflag [#allocation3], %s539_s22 }
 0x222   : > { %1153 = vrot.lane.b32.xlu0 %v2090_v61, %s1892_s26 }
 0x223   : > { %1155 = vrot.lane.b32.xlu1 %v2092_v62, %s1892_s26  ;;  %s2357_s26 = sld [smem:[#allocation10_spill]] }
 0x226   : > { %1231 = vrot.lane.b32.xlu0 %v2090_v61, %s1893_s0 }
 0x227   : > { %1233 = vrot.lane.b32.xlu1 %v2092_v62, %s1893_s0 }
 0x229   : > { %s2358_s0 = smov %s2357_s26  ;;  %v1668_v11 = vld [vmem:[%s2357_s26 + $0x4] sm:$0x3]  ;;  %s1651_s26 = sshll.u32 %s539_s22, 4 }
 0x22a   : > { %817 = vrot.lane.b32.xlu0 %v2090_v61, %s1894_s19  ;;  %v956_v12 = vrot.slane %v1668_v11, %v2130_v9  ;;  %v960_v13 = vrot.slane %v1668_v11, %v2132_v10  ;;  %v1672_v15 = vld [vmem:[%s2358_s0 + $0x6] sm:$0x3]  ;;  %v1679_v43 = vld [vmem:[%s2358_s0 + $0xa] sm:$0x3]  ;;  %v1662_v45 = vld [vmem:[%s2358_s0 + $0x2] sm:$0x3] }
 0x22b   : > { %819 = vrot.lane.b32.xlu1 %v2092_v62, %s1894_s19  ;;  %v1034_v20 = vrot.slane %v1672_v15, %v2130_v9  ;;  %v1038_v21 = vrot.slane %v1672_v15, %v2132_v10  ;;  %v1170_v47 = vrot.slane %v1679_v43, %v2132_v10  ;;  %v830_v48 = vrot.slane %v1662_v45, %v2130_v9  ;;  %s1702_s19 = sshll.u32 %s2010_s28, 8 }
 0x22c   : > { %v834_v49 = vrot.slane %v1662_v45, %v2132_v10  ;;  %s2280_s18 = scalar_lea.hbm %s2339_s17, %s1702_s19 }
 0x22e   : > { %1309 = vrot.lane.b32.xlu0 %v2090_v61, %s1895_s20 }
 0x22f   : > { %1311 = vrot.lane.b32.xlu1 %v2092_v62, %s1895_s20  ;;  %s541_s20 = scalar_lea.vmem [#allocation2], %s1651_s26  ;;  %s1898_s26 = smov [#allocation2]  }
 0x232   : > { %791 = vrot.lane.b32.xlu0 %v2090_v61, %s1896_s23 }
 0x233   : > { %793 = vrot.lane.b32.xlu1 %v2092_v62, %s1896_s23  ;;  %s1588_s23 = sshll.u32 %s541_s20, 4  ;;  %s2282_s23 = int_to_ptr.vmem [resolvable:$true] %s1588_s23 }
 0x234   : > { %s1825_s28 = scalar_lea.vmem %s2282_s23, 256 }
 0x235   : > { %p1826_p11 = scmp.ne.s32.totalorder %s2282_s23, %s1825_s28 }
 0x236   : > { %1387 = vrot.lane.b32.xlu0 %v2090_v61, %s1897_s29  ;;  %v1105_v61 = vsel %vm560_vm0, %v789_v55, 0 }
 0x237   : > { %1389 = vrot.lane.b32.xlu1 %v2092_v62, %s1897_s29  ;;  %v800_v62 = vld [vmem:[%s2358_s0] sm:$0x3]  ;;  %p1827_p12 = pnand %p1826_p11, %p2027_p5 }
 0x238   : > { %v805_v6 = vrot.slane %v800_v62, %v2130_v9  ;;  %v809_v7 = vrot.slane %v800_v62, %v2132_v10 }
 0x239   : > { %p1828_p13 = pneg %p1827_p12 }
 0x23a   : > { %1468 = vperm.xlu0 %1781, %v1465_v63  }
 0x23b   : > { %683 = vperm.xlu1 %1782, %v635_v1  }
 0x23e   : > { %1476 = vperm.xlu0 %1781, %v1473_v2  }
 0x23f   : > { %691 = vperm.xlu1 %1782, %v688_v3   ;;  %v1166_v3 = vrot.slane %v1679_v43, %v2130_v9 }
 0x242   : > { %1546 = vperm.xlu0 %1781, %v1543_v4  }
 0x243   : > { %1554 = vperm.xlu1 %1782, %v1551_v5  }
 0x28c   : > { %v944_v14 = vpop.permute.xlu0 %943 }
 0x28d   : > { %v946_v16 = vpop.permute.xlu1 %945 }
 0x28e   : > { %v948_v17 = vsel %vm947_vm2, %v944_v14, %v946_v16  ;;  %v949_v18 = vsel %vm947_vm2, %v946_v16, %v944_v14  ;;  %v1663_v14 = vld [vmem:[%s2333_s11 + $0x4] sm:$0xf] }
 0x28f   : > { %v963_v19 = vmul.f32 %v956_v12, %v949_v18  ;;  %v964_v22 = vmul.f32 %v960_v13, %v948_v17  ;;  %v1683_v12 = vld [vmem:[%s2358_s0 + $0xc] sm:$0x3] }
 0x290   : > { %v1022_v23 = vpop.permute.xlu0 %1021 }
 0x291   : > { %v1024_v24 = vpop.permute.xlu1 %1023  ;;  %v966_v25 = vpack.c.bf16 %v964_v22, %v964_v22  ;;  %v965_v26 = vpack.c.bf16 %v963_v19, %v963_v19  ;;  %v1248_v19 = vrot.slane %v1683_v12, %v2132_v10 }
 0x292   : > { %v1026_v27 = vsel %vm1025_vm3, %v1022_v23, %v1024_v24  ;;  %v1027_v28 = vsel %vm1025_vm3, %v1024_v24, %v1022_v23 }
 0x293   : > { %v1041_v29 = vmul.f32 %v1034_v20, %v1027_v28  ;;  %v1042_v30 = vmul.f32 %v1038_v21, %v1026_v27  ;;  %1670 = vmatprep.subr.msk.bf16.mxu1 %vm560_vm0, %v966_v25  ;;  %v973_v33 = vsel %vm560_vm0, %v965_v26, 0  ;;  %v1676_v28 = vld [vmem:[%s2333_s11 + $0x10] sm:$0xf] }
 0x294   : > { %v1154_v34 = vpop.permute.xlu0 %1153  ;;  %979 = vmatpush1.bf16.msra.mxu1 %v973_v33 }
 0x295   : > { %v1043_v36 = vpack.c.bf16 %v1041_v29, %v1041_v29  ;;  %v1044_v39 = vpack.c.bf16 %v1042_v30, %v1042_v30  ;;  %v1156_v40 = vpop.permute.xlu1 %1155  ;;  %v1244_v29 = vrot.slane %v1683_v12, %v2130_v9 }
 0x296   : > { %v1159_v50 = vsel %vm1157_vm4, %v1156_v40, %v1154_v34  ;;  %v1158_v11 = vsel %vm1157_vm4, %v1154_v34, %v1156_v40 }
 0x297   : > { %1671 = vmatmul.mubr.msk.bf16.vlgmr.msra.gmra.mrb[0].mxu1 %vm556_vm1, %v1669_v35  ;;  %1674 = vmatprep.subr.msk.bf16.mxu1 %vm560_vm0, %v1044_v39  ;;  %v1051_v41 = vsel %vm560_vm0, %v1043_v36, 0  ;;  %v1174_v56 = vmul.f32 %v1170_v47, %v1159_v50  ;;  %v1173_v18 = vmul.f32 %v1166_v3, %v1158_v11  ;;  %v1687_v35 = vld [vmem:[%s2358_s0 + $0xe] sm:$0x3]  ;;  %v816_v36 = vld [vmem:[%s2333_s11] sm:$0xf] }
 0x298   : > { %v2159_v44 = vpop.permute.xlu0 %1231  ;;  %1057 = vmatpush1.bf16.msra.mxu1 %v1051_v41  ;;  %1088 = vmatprep.mubr.bf16.mxu1 %v1889_v0  ;;  %v1326_v40 = vrot.slane %v1687_v35, %v2132_v10  ;;  %v1322_v45 = vrot.slane %v1687_v35, %v2130_v9 }
 0x299   : > { %v1234_v46 = vpop.permute.xlu1 %1233  ;;  %1677 = vmatprep.subr.msk.bf16.mxu1 %vm560_vm0, %v790_v42  ;;  %v1176_v4 = vpack.c.bf16 %v1174_v56, %v1174_v56  ;;  %v1175_v25 = vpack.c.bf16 %v1173_v18, %v1173_v18 }
 0x29a   : > { %v1237_v22 = vsel %vm1235_vm7, %v1234_v46, %v2159_v44  ;;  %v1236_v34 = vsel %vm1235_vm7, %v2159_v44, %v1234_v46  ;;  %v1680_v44 = vld [vmem:[%s2333_s11 + $0x14] sm:$0xf] }
 0x29b   : > { %v1252_v26 = vmul.f32 %v1248_v19, %v1237_v22  ;;  %v1183_v33 = vsel %vm560_vm0, %v1175_v25, 0  ;;  %v1251_v39 = vmul.f32 %v1244_v29, %v1236_v34 }
 0x29c   : > { %v818_v51 = vpop.permute.xlu0 %817 }
 0x29d   : > { %v820_v52 = vpop.permute.xlu1 %819  ;;  %v1254_v30 = vpack.c.bf16 %v1252_v26, %v1252_v26  ;;  %v1253_v42 = vpack.c.bf16 %v1251_v39, %v1251_v39 }
 0x29e   : > { %v822_v53 = vsel %vm821_vm5, %v818_v51, %v820_v52  ;;  %v823_v54 = vsel %vm821_vm5, %v820_v52, %v818_v51 }
 0x29f   : > { %v837_v57 = vmul.f32 %v830_v48, %v823_v54  ;;  %v838_v58 = vmul.f32 %v834_v49, %v822_v53  ;;  %v1261_v47 = vsel %vm560_vm0, %v1253_v42, 0  ;;  %v1691_v49 = vld [vmem:[%s2358_s0 + $0x10] sm:$0x3]  ;;  %s1829_s0 = sshll.u32 %s1898_s26, 4  ;;  %s1830_s0 = int_to_ptr.vmem [resolvable:$false] %s1829_s0 }
 0x2a0   : > { %v2175_v59 = vpop.permute.xlu0 %1309  ;;  %v1404_v53 = vrot.slane %v1691_v49, %v2132_v10  ;;  %s1831_s2 = scalar_lea.vmem %s1830_s0, 512  ;;  %p1832_p0 = scmp.lt.s32.totalorder %s2282_s23, %s1830_s0 }
 0x2a1   : > { %v839_v63 = vpack.c.bf16 %v837_v57, %v837_v57  ;;  %v840_v1 = vpack.c.bf16 %v838_v58, %v838_v58  ;;  %v1312_v2 = vpop.permute.xlu1 %1311  ;;  %v1684_v57 = vld [vmem:[%s2333_s11 + $0x18] sm:$0xf]  ;;  %v1400_v58 = vrot.slane %v1691_v49, %v2130_v9  ;;  %p1833_p1 = scmp.lt.s32.totalorder %s1831_s2, %s1825_s28 }
 0x2a2   : > { %v1315_v41 = vsel %vm1313_vm8, %v1312_v2, %v2175_v59  ;;  %v1314_v48 = vsel %vm1313_vm8, %v2175_v59, %v1312_v2 }
 0x2a3   : > { %1664 = vmatprep.subr.msk.bf16.mxu0 %vm560_vm0, %v840_v1  ;;  %1675 = vmatmul.mubr.msk.bf16.vlgmr.msra.gmra.mrb[0].mxu1 %vm556_vm1, %v1673_v60  ;;  %v847_v5 = vsel %vm560_vm0, %v839_v63, 0  ;;  %v1330_v43 = vmul.f32 %v1326_v40, %v1315_v41  ;;  %v1329_v52 = vmul.f32 %v1322_v45, %v1314_v48  ;;  %v1688_v63 = vld [vmem:[%s2333_s11 + $0x1c] sm:$0xf]  ;;  %v1692_v1 = vld [vmem:[%s2333_s11 + $0x20] sm:$0xf]  ;;  %p1834_p2 = por %p1833_p1, %p1832_p0 }
 0x2a4   : > { %1111 = vmatpush1.bf16.msra.mxu1 %v1105_v61  ;;  %v792_v13 = vpop.permute.xlu0 %791  ;;  %853 = vmatpush1.bf16.msra.mxu0 %v847_v5 }
 0x2a5   : > { %1681 = vmatprep.subr.msk.bf16.mxu1 %vm560_vm0, %v1176_v4  ;;  %v794_v15 = vpop.permute.xlu1 %793  ;;  %1142 = vmatprep.mubr.bf16.mxu1 %v1889_v0  ;;  %v1332_v46 = vpack.c.bf16 %v1330_v43, %v1330_v43  ;;  %v1331_v55 = vpack.c.bf16 %v1329_v52, %v1329_v52  ;;  %p1835_p3 = pnand %p1834_p2, %p1828_p13 }
 0x2a6   : > { %v798_v16 = vsel %vm797_vm6, %v792_v13, %v794_v15  ;;  %v799_v17 = vsel %vm797_vm6, %v794_v15, %v792_v13 }
 0x2a7   : > { %v812_v20 = vmul.f32 %v805_v6, %v799_v17  ;;  %v813_v21 = vmul.f32 %v809_v7, %v798_v16  ;;  %1665 = vmatmul.mubr.msk.bf16.vlgmr.msra.gmra.mrb[12].mxu0 %vm556_vm1, %v1663_v14  ;;  %v1339_v8 = vsel %vm560_vm0, %v1331_v55, 0  ;;  %v1497_v55 = vld [vmem:[%s2336_s14] sm:$0xf] }
 0x2a8   : > { %934 = vmatprep.mubr.bf16.mxu0 %v1889_v0  ;;  %v1388_v50 = vpop.permute.xlu0 %1387 }
 0x2a9   : > { %v814_v23 = vpack.c.bf16 %v812_v20, %v812_v20  ;;  %v815_v24 = vpack.c.bf16 %v813_v21, %v813_v21  ;;  %v1390_v51 = vpop.permute.xlu1 %1389 }
 0x2aa   : > { %v1393_v54 = vsel %vm1391_vm9, %v1390_v51, %v1388_v50  ;;  %v1392_v60 = vsel %vm1391_vm9, %v1388_v50, %v1390_v51 }
 0x2ab   : > { %1666 = vmatprep.subr.msk.bf16.mxu0 %vm560_vm0, %v815_v24  ;;  %v897_v27 = vsel %vm560_vm0, %v814_v23, 0  ;;  %v1408_v56 = vmul.f32 %v1404_v53, %v1393_v54  ;;  %v1407_v10 = vmul.f32 %v1400_v58, %v1392_v60 }
 0x2ac   : > { %903 = vmatpush1.bf16.msra.mxu0 %v897_v27 }
 0x2ad   : > { %v1410_v59 = vpack.c.bf16 %v1408_v56, %v1408_v56  ;;  %v1409_v62 = vpack.c.bf16 %v1407_v10, %v1407_v10 }
 0x2af   : > { %1678 = vmatmul.mubr.msk.bf16.vlgmr.msra.gmra.mrb[0].mxu1 %vm556_vm1, %v1676_v28  ;;  %v1417_v9 = vsel %vm560_vm0, %v1409_v62, 0 }
 0x2b0   : > { %1189 = vmatpush1.bf16.msra.mxu1 %v1183_v33  ;;  %1220 = vmatprep.mubr.bf16.mxu1 %v1889_v0 }
 0x2b1   : > { %1685 = vmatprep.subr.msk.bf16.mxu1 %vm560_vm0, %v1254_v30 }
 0x2b3   : > { %1667 = vmatmul.mubr.msk.bf16.vlgmr.msra.gmra.mrb[12].mxu0 %vm556_vm1, %v816_v36 }
 0x2b4   : > { %1534 = vmatprep.mubr.bf16.mxu0 %v1889_v0 }
 0x2ba   : > { %v684_v5 = vpop.permute.xlu1 %683 }
 0x2bb   : > { %1682 = vmatmul.mubr.msk.bf16.vlgmr.msra.gmra.mrb[0].mxu1 %vm556_vm1, %v1680_v44  ;;  %v686_v7 = vmul.f32 %v684_v5, %v2086_v37  ;;  %v687_v11 = vmul.f32 %v684_v5, %v2088_v38 }
 0x2bc   : > { %1267 = vmatpush1.bf16.msra.mxu1 %v1261_v47  ;;  %1298 = vmatprep.mubr.bf16.mxu1 %v1889_v0 }
 0x2bd   : > { %1689 = vmatprep.subr.msk.bf16.mxu1 %vm560_vm0, %v1332_v46 }
 0x2be   : > { %v692_v6 = vpop.permute.xlu1 %691 }
 0x2bf   : > { %v694_v12 = vadd.f32 %v692_v6, %v686_v7  ;;  %v695_v13 = vadd.f32 %v692_v6, %v687_v11 }
 0x2c1   : > { %v696_v14 = vsub.f32 0.0, %v694_v12  ;;  %v697_v15 = vsub.f32 0.0, %v695_v13 }
 0x2c3   : > { %v698_v17 = vmul.f32 1.442695, %v696_v14  ;;  %v700_v20 = vmul.f32 1.442695, %v697_v15 }
 0x2c5   : > { %1801 = vpow2.f32 %v698_v17 }
 0x2c6   : > { %1803 = vpow2.f32 %v700_v20 }
 0x2c7   : > { %1686 = vmatmul.mubr.msk.bf16.vlgmr.msra.gmra.mrb[0].mxu1 %vm556_vm1, %v1684_v57 }
 0x2c8   : > { %1345 = vmatpush1.bf16.msra.mxu1 %v1339_v8  ;;  %1376 = vmatprep.mubr.bf16.mxu1 %v1889_v0  ;;  %v1555_v8 = vpop.permute.xlu1 %1554 }
 0x2c9   : > { %1693 = vmatprep.subr.msk.bf16.mxu1 %vm560_vm0, %v1410_v59 }
 0x2cf   : > { %v1802_v33 = vpop.eup %1801 }
 0x2d0   : > { %v1804_v34 = vpop.eup %1803  ;;  %v702_v35 = vadd.f32 1.0, %v1802_v33 }
 0x2d1   : > { %v703_v36 = vadd.f32 1.0, %v1804_v34 }
 0x2d3   : > { %1690 = vmatmul.mubr.msk.bf16.vlgmr.msra.gmra.mrb[0].mxu1 %vm556_vm1, %v1688_v63 }
 0x2d4   : > { %1423 = vmatpush1.bf16.msra.mxu1 %v1417_v9  ;;  %1454 = vmatprep.mubr.bf16.mxu1 %v1889_v0  ;;  %v1469_v0 = vpop.permute.xlu0 %1468 }
 0x2d8   : > { %v1477_v25 = vpop.permute.xlu0 %1476 }
 0x2dc   : > { %v1547_v56 = vpop.permute.xlu0 %1546 }
 0x2df   : > { %1694 = vmatmul.mubr.msk.bf16.vlgmr.msra.gmra.mrb[0].mxu1 %vm556_vm1, %v1692_v1 }
 0x386   : > { %v936_v2 = vpop.f32.mrb[12].mxu0 }
 0x387   : > { %v938_v3 = vpop.f32.mrb[13].mxu0 }
 0x388   : > { %v940_v61 = vpop.f32.mrb[14].mxu0 }
 0x389   : > { %v941_v4 = vpop.f32.mrb[15].mxu0 }
 0x3b2   : > { %v1456_v16 = vpop.f32.mrb[0].mxu1 }
 0x3b3   : > { %v1703_v18 = vadd.f32 %v1456_v16, %v936_v2  ;;  %v1458_v19 = vpop.f32.mrb[1].mxu1 }
 0x3b4   : > { %v1704_v21 = vadd.f32 %v1458_v19, %v938_v3  ;;  %v1460_v22 = vpop.f32.mrb[2].mxu1 }
 0x3b5   : > { %v1471_v23 = vmul.f32 %v1703_v18, %v1469_v0  ;;  %v1461_v24 = vpop.f32.mrb[3].mxu1 }
 0x3b6   : > { %v1472_v26 = vmul.f32 %v1704_v21, %v1469_v0 }
 0x3b7   : > { %v1479_v37 = vadd.f32 %v1477_v25, %v1471_v23 }
 0x3b8   : > { %v1480_v38 = vadd.f32 %v1477_v25, %v1472_v26 }
 0x3b9   : > { %v1481_v27 = vsub.f32 0.0, %v1479_v37 }
 0x3ba   : > { %v1482_v28 = vsub.f32 0.0, %v1480_v38 }
 0x3bb   : > { %v1483_v29 = vmul.f32 1.442695, %v1481_v27 }
 0x3bc   : > { %v1485_v30 = vmul.f32 1.442695, %v1482_v28 }
 0x3bd   : > { %1805 = vpow2.f32 %v1483_v29 }
 0x3be   : > { %1807 = vpow2.f32 %v1485_v30 }
 0x3bf   : > { %1809 = vrcp.f32 %v702_v35 }
 0x3c0   : > { %1811 = vrcp.f32 %v703_v36 }
 0x3c7   : > { %v1806_v39 = vpop.eup %1805 }
 0x3c8   : > { %v1808_v40 = vpop.eup %1807  ;;  %v1487_v41 = vadd.f32 1.0, %v1806_v39 }
 0x3c9   : > { %v1488_v42 = vadd.f32 1.0, %v1808_v40  ;;  %v1810_v43 = vpop.eup %1809 }
 0x3ca   : > { %1813 = vrcp.f32 %v1487_v41  ;;  %v1812_v44 = vpop.eup %1811  ;;  %v706_v49 = vmul.f32 %v1810_v43, %v694_v12 }
 0x3cb   : > { %1815 = vrcp.f32 %v1488_v42  ;;  %v707_v51 = vmul.f32 %v1812_v44, %v695_v13 }
 0x3d4   : > { %v1814_v45 = vpop.eup %1813 }
 0x3d5   : > { %v1816_v46 = vpop.eup %1815  ;;  %v1491_v47 = vmul.f32 %v1814_v45, %v1479_v37 }
 0x3d6   : > { %v1492_v48 = vmul.f32 %v1816_v46, %v1480_v38 }
 0x3d7   : > { %v1493_v50 = vadd.f32 %v1491_v47, %v2071_v31 }
 0x3d8   : > { %v1494_v52 = vadd.f32 %v1492_v48, %v2073_v32 }
 0x3d9   : > { %v1495_v53 = vpack.c.bf16 %v706_v49, %v1493_v50 }
 0x3da   : > { %v1496_v54 = vpack.c.bf16 %v707_v51, %v1494_v52 }
 0x3dc   : > { %1502 = vmatprep.subr.bf16.mxu0 %v1496_v54 }
 0x3dd   : > { %1503 = vmatpush1.bf16.msra.mxu0 %v1495_v53 }
 0x3e0   : > { %1695 = vmatmul.mubr.msk.bf16.vlgmr.msra.gmra.mrb[16].mxu0 %vm1498_vm10, %v1497_v55 }
 0x4b3   : > { %v1536_v57 = vpop.f32.mrb[16].mxu0 }
 0x4b4   : > { %v1549_v58 = vmul.f32 %v1547_v56, %v1536_v57  ;;  %v1538_v59 = vpop.f32.mrb[17].mxu0 }
 0x4b5   : > { %v1550_v60 = vmul.f32 %v1547_v56, %v1538_v59  ;;  %v1540_v31 = vpop.f32.mrb[18].mxu0 }
 0x4b6   : > { %v1557_v10 = vadd.f32 %v1555_v8, %v1549_v58  ;;  %v1541_v32 = vpop.f32.mrb[19].mxu0 }
 0x4b7   : > { %v1558_v62 = vadd.f32 %v1555_v8, %v1550_v60 }
 0x4b8   : > { %v1559_v63 = vsub.f32 0.0, %v1557_v10 }
 0x4b9   : > { %v1560_v9 = vsub.f32 0.0, %v1558_v62 }
 0x4ba   : > { %v1561_v1 = vmul.f32 1.442695, %v1559_v63 }
 0x4bb   : > { %v1563_v2 = vmul.f32 1.442695, %v1560_v9 }
 0x4bc   : > { %1817 = vpow2.f32 %v1561_v1 }
 0x4bd   : > { %1819 = vpow2.f32 %v1563_v2 }
 0x4c6   : > { %v1818_v3 = vpop.eup %1817 }
 0x4c7   : > { %v1820_v61 = vpop.eup %1819  ;;  %v1565_v4 = vadd.f32 1.0, %v1818_v3 }
 0x4c8   : > { %v1566_v5 = vadd.f32 1.0, %v1820_v61 }
 0x4c9   : > { %1821 = vrcp.f32 %v1565_v4 }
 0x4ca   : > { %1823 = vrcp.f32 %v1566_v5 }
 0x4d3   : > { %v1822_v6 = vpop.eup %1821 }
 0x4d4   : > { %v1824_v7 = vpop.eup %1823  ;;  %v1569_v11 = vmul.f32 %v1822_v6, %v1557_v10 }
 0x4d5   : > { %v1570_v12 = vmul.f32 %v1824_v7, %v1558_v62 }
 0x4d6   : > { %1571 = vst [vmem:[%s541_s20] sm:$0xff] %v1569_v11 }
 0x4d7   : > { %1572 = vst [vmem:[%s541_s20 + $0x8] sm:$0xff] %v1570_v12 }
 0x4d8   : > { %1838 = shalt.err (!%p1835_p3)
}
 0x4d9   : > { %s1839_s22 = scalar_lea.hbm %s2280_s18, 256  ;;  %s1843_s29 = scalar_lea.hbm %s2339_s17, 512 }
 0x4da   : > { %p1840_p4 = scmp.ne.s32.totalorder %s2280_s18, %s1839_s22  ;;  %p1844_p9 = scmp.lt.u32.totalorder %s2280_s18, %s2339_s17 }
 0x4db   : > { %p1845_p10 = scmp.lt.u32.totalorder %s1843_s29, %s1839_s22  ;;  %p1847_p12 = scmp.lt.u32.totalorder %s1839_s22, %s2280_s18 }
 0x4dc   : > { %p1841_p7 = pnand %p1840_p4, %p2027_p5 }
 0x4dd   : > { %p1846_p11 = por %p1845_p10, %p1844_p9 }
 0x4de   : > { %p1842_p8 = pneg %p1841_p7 }
 0x4df   : > { %p1848_p13 = por %p1847_p12, %p1846_p11 }
 0x4e1   : > { %p1849_p0 = pnand %p1848_p13, %p1842_p8 }
 0x4e3   : > { %1852 = shalt.err (!%p1849_p0)
}
 0x4e4   : > { %1733 = dma.vmem_to_hbm [thread:$0]  (%p2027_p5), %s2282_s23, 256, %s2280_s18, %s1574_s21  }
 0x4e5 PF: > { %p1739_p1 = scmp.ge.s32.totalorder %s1887_s27, 2  ;;  %s1600_s28 = sand.u32 1, %s1875_s24  }
 0x4e6   : > { %s1601_s26 = scalar_lea.sflag [#allocation3], %s1600_s28 }
 0x4e7   : > { %p1736_p2 = pnand %p1739_p1, %p2031_p6 }
 0x4e9   : > { %1870 = dma.done.wait (!%p1736_p2), %s1601_s26, 256  }
 0x4ea   : > { %1872 = vsyncadd (!%p1736_p2), %s1601_s26, 4294967040  ;;  %s2360_s27 = sld [smem:[#allocation6_spill]]  ;;  %s2361_s22 = sld [smem:[#allocation5_spill]] }
 0x4eb   : > { %s2362_s26 = sld [smem:[#allocation7_spill]]  ;;  %s2363_s24 = smov %s1879_s25 }
 0x4f0   : > { %p27_p3 = scmp.ge.s32.totalorder %s2360_s27, 4   ;;  %s2364_s25 = smov %s2361_s22 }
 0x4f2   :  { %29 = sbr.rel (!%p27_p3) target bundleno = 7 (0x7), region = 138 }
 0x4f9   :  { %1606 = vsyncpa [#allocation3], 1 }
 0x4fa   :  { %1608 = vsyncpa [#allocation3 + $0x1], 1 }

</bundles_post_ra>
